<compile_context>
chip_gen: v6e
topology: v6e:2x2x1
jax: 0.10.0
libtpu: 0.0.40
codegen_flags: <defaults>
</compile_context>

<pallas_src>
import jax
import jax.numpy as jnp
from jax.experimental import pallas as pl
from jax.experimental.pallas import tpu as pltpu

LANE = 128                    # lane width (last dim)
SUBLANE = 8                   # f32 sublane quantum
MAX_SUBLANES_PER_STEP = 1024  # NB * TR cap -> ~5 MiB moved per grid step


def grouped_conv1x1_kernel(w_ref, x_ref, o_ref):
    """w_ref: (12,) f32 in SMEM, w_ref[3*o + c] = weight[o, c, 0].
    x_ref: (NB, 6, TR, 128) VMEM tile (L on sublanes+lanes, channels major).
    o_ref: (NB, 4, TR, 128) VMEM tile.
    out[:, o] = sum_c w[o, c] * x[:, 3*(o//2) + c]   (groups=2, kernel_size=1)
    Each operand/result is a dense (TR, 128) slab -> full-sublane vregs,
    unmasked vector stores.
    """
    for o in range(4):
        g = o // 2          # group of output channel o
        base = 3 * g        # first input channel of that group
        acc = (w_ref[3 * o + 0] * x_ref[:, base + 0: base + 1, :, :]
               + w_ref[3 * o + 1] * x_ref[:, base + 1: base + 2, :, :]
               + w_ref[3 * o + 2] * x_ref[:, base + 2: base + 3, :, :])
        o_ref[:, o: o + 1, :, :] = acc.astype(o_ref.dtype)


def _choose_tiles(N, L):
    """Pick (NB, TR, R_pad): batch rows per block, sublane-rows per L tile, and
    padded row count so tiles always satisfy the (8, 128) / full-dim rule."""
    R = -(-L // LANE)  # ceil(L / 128) rows of 128 lanes
    if R <= MAX_SUBLANES_PER_STEP:
        tr, r_pad = R, R                       # whole (lane-padded) L in one tile
    else:
        tr, r_pad = None, R
        cand = (MAX_SUBLANES_PER_STEP // SUBLANE) * SUBLANE
        while cand >= 64:                      # largest mult-of-8 divisor of R
            if R % cand == 0:
                tr = cand
                break
            cand -= SUBLANE
        if tr is None:                         # no usable divisor: pad R instead
            tr = 256
            r_pad = -(-R // tr) * tr
    nb = min(N, max(1, MAX_SUBLANES_PER_STEP // tr))
    while N % nb != 0:
        nb -= 1
    # Keep at least 2 grid steps when possible so v7x's 2 TensorCores both work.
    if (N // nb) * (r_pad // tr) < 2 and nb % 2 == 0:
        nb //= 2
    return nb, tr, r_pad


def conv1d_groups(x, weight):
    """x: (N, 6, L); weight: (4, 3, 1) float32 (PyTorch Conv1d layout)."""
    N, C_in, L = x.shape
    C_out, C_in_g, K = weight.shape
    assert C_in == 6 and C_out == 4 and C_in_g == 3 and K == 1

    # w_flat[3*o + c] = weight[o, c, 0]; kept in f32 so accumulation is f32.
    w_flat = weight.reshape(-1).astype(jnp.float32)

    nb, tr, r_pad = _choose_tiles(N, L)
    L_pad = r_pad * LANE
    x_p = x if L_pad == L else jnp.pad(x, ((0, 0), (0, 0), (0, L_pad - L)))
    # Free reshape: L stays lane-major, split across (sublane, lane) dims.
    x4 = x_p.reshape(N, C_in, r_pad, LANE)

    grid = (N // nb, r_pad // tr)
    itemsize = jnp.dtype(x.dtype).itemsize

    out4 = pl.pallas_call(
        grouped_conv1x1_kernel,
        out_shape=jax.ShapeDtypeStruct((N, C_out, r_pad, LANE), x.dtype),
        grid=grid,
        in_specs=[
            # 12 weight scalars resident in SMEM (no per-step DMA).
            pl.BlockSpec(memory_space=pltpu.MemorySpace.SMEM),
            pl.BlockSpec((nb, C_in, tr, LANE), lambda n, r: (n, 0, r, 0)),
        ],
        out_specs=pl.BlockSpec((nb, C_out, tr, LANE), lambda n, r: (n, 0, r, 0)),
        compiler_params=pltpu.CompilerParams(
            dimension_semantics=("parallel", "parallel"),
            vmem_limit_bytes=32 * 1024 * 1024),
        cost_estimate=pl.CostEstimate(
            flops=20 * N * L,                      # 3 mul + 2 add per out elem, 4 out ch
            transcendentals=0,
            bytes_accessed=(C_in + C_out) * N * L * itemsize),
    )(w_flat, x4)

    out = out4.reshape(N, C_out, L_pad)
    if L_pad != L:
        out = out[:, :, :L]
    return out


def make_weight():
    """Deterministic init matching TestConv1dGroups.init_weights(): weight[o, k, 0] = o + 1."""
    return (jnp.arange(1, 5, dtype=jnp.float32)[:, None, None]
            * jnp.ones((1, 3, 1), jnp.float32))


def _reference(x, weight):
    """Pure-JAX grouped conv1d (kernel_size=1, groups=2, no bias)."""
    g0 = jnp.einsum("ncl,oc->nol", x[:, 0:3, :], weight[0:2, :, 0])
    g1 = jnp.einsum("ncl,oc->nol", x[:, 3:6, :], weight[2:4, :, 0])
    return jnp.concatenate([g0, g1], axis=1)


if __name__ == "__main__":
    weight = make_weight()

    # Shape consistent with the module: N=2, C_in=6, L=16 (lane-padding path).
    N, C_in, L = 2, 6, 16
    x = jax.random.normal(jax.random.PRNGKey(0), (N, C_in, L), dtype=jnp.float32)
    out = jax.block_until_ready(conv1d_groups(x, weight))
    assert out.shape == (N, 4, L), out.shape
    assert jnp.allclose(out, _reference(x, weight), atol=1e-5, rtol=1e-5)

    # L a multiple of 128 (no padding, several sublane rows per tile).
    x2 = jax.random.normal(jax.random.PRNGKey(1), (N, C_in, 384), dtype=jnp.float32)
    out2 = jax.block_until_ready(conv1d_groups(x2, weight))
    assert out2.shape == (N, 4, 384), out2.shape
    assert jnp.allclose(out2, _reference(x2, weight), atol=1e-5, rtol=1e-5)

    # L not a multiple of 128 -> exercises the padding + crop path.
    x3 = jax.random.normal(jax.random.PRNGKey(2), (N, C_in, 200), dtype=jnp.float32)
    out3 = jax.block_until_ready(conv1d_groups(x3, weight))
    assert out3.shape == (N, 4, 200), out3.shape
    assert jnp.allclose(out3, _reference(x3, weight), atol=1e-5, rtol=1e-5)

    print("KERNEL_OK")
</pallas_src>

<mosaic_0001>
module attributes {stable_mosaic.version = 11 : i64} {
  func.func @grouped_conv1x1_kernel(%arg0: i32, %arg1: i32, %arg2: memref<12xf32, #tpu.memory_space<smem>>, %arg3: memref<1x6x1x128xf32, #tpu.memory_space<vmem>>, %arg4: memref<1x4x1x128xf32, #tpu.memory_space<vmem>>) attributes {dimension_semantics = [#tpu.dimension_semantics<parallel>, #tpu.dimension_semantics<parallel>], iteration_bounds = array<i64: 2, 1>, scalar_prefetch = 0 : i64, scratch_operands = 0 : i64, tpu.core_type = #tpu.core_type<tc>, window_params = [{transform_indices = @transform_0, window_bounds = array<i64: 12>}, {transform_indices = @transform_1, window_bounds = array<i64: 1, 6, 1, 128>}, {transform_indices = @transform_2, window_bounds = array<i64: 1, 4, 1, 128>}]} {
    %c0 = arith.constant 0 : index
    %0 = memref.load %arg2[%c0] : memref<12xf32, #tpu.memory_space<smem>>
    %c0_0 = arith.constant 0 : index
    %c0_1 = arith.constant 0 : index
    %c0_2 = arith.constant 0 : index
    %c0_3 = arith.constant 0 : index
    %1 = vector.load %arg3[%c0_0, %c0_1, %c0_2, %c0_3] : memref<1x6x1x128xf32, #tpu.memory_space<vmem>>, vector<1x1x1x128xf32>
    %2 = vector.broadcast %0 : f32 to vector<1x1x1x128xf32>
    %3 = arith.mulf %2, %1 : vector<1x1x1x128xf32>
    %c1 = arith.constant 1 : index
    %4 = memref.load %arg2[%c1] : memref<12xf32, #tpu.memory_space<smem>>
    %c0_4 = arith.constant 0 : index
    %c1_5 = arith.constant 1 : index
    %c0_6 = arith.constant 0 : index
    %c0_7 = arith.constant 0 : index
    %5 = vector.load %arg3[%c0_4, %c1_5, %c0_6, %c0_7] : memref<1x6x1x128xf32, #tpu.memory_space<vmem>>, vector<1x1x1x128xf32>
    %6 = vector.broadcast %4 : f32 to vector<1x1x1x128xf32>
    %7 = arith.mulf %6, %5 : vector<1x1x1x128xf32>
    %8 = arith.addf %3, %7 : vector<1x1x1x128xf32>
    %c2 = arith.constant 2 : index
    %9 = memref.load %arg2[%c2] : memref<12xf32, #tpu.memory_space<smem>>
    %c0_8 = arith.constant 0 : index
    %c2_9 = arith.constant 2 : index
    %c0_10 = arith.constant 0 : index
    %c0_11 = arith.constant 0 : index
    %10 = vector.load %arg3[%c0_8, %c2_9, %c0_10, %c0_11] : memref<1x6x1x128xf32, #tpu.memory_space<vmem>>, vector<1x1x1x128xf32>
    %11 = vector.broadcast %9 : f32 to vector<1x1x1x128xf32>
    %12 = arith.mulf %11, %10 : vector<1x1x1x128xf32>
    %13 = arith.addf %8, %12 : vector<1x1x1x128xf32>
    %c0_12 = arith.constant 0 : index
    %c0_13 = arith.constant 0 : index
    %c0_14 = arith.constant 0 : index
    %c0_15 = arith.constant 0 : index
    %14 = vector.load %arg4[%c0_12, %c0_13, %c0_14, %c0_15] : memref<1x4x1x128xf32, #tpu.memory_space<vmem>>, vector<1x1x1x128xf32>
    tpu.vector_store %arg4[%c0_12, %c0_13, %c0_14, %c0_15], %13 {strides = array<i32>} : memref<1x4x1x128xf32, #tpu.memory_space<vmem>>, vector<1x1x1x128xf32>,
    %c3 = arith.constant 3 : index
    %15 = memref.load %arg2[%c3] : memref<12xf32, #tpu.memory_space<smem>>
    %c0_16 = arith.constant 0 : index
    %c0_17 = arith.constant 0 : index
    %c0_18 = arith.constant 0 : index
    %c0_19 = arith.constant 0 : index
    %16 = vector.load %arg3[%c0_16, %c0_17, %c0_18, %c0_19] : memref<1x6x1x128xf32, #tpu.memory_space<vmem>>, vector<1x1x1x128xf32>
    %17 = vector.broadcast %15 : f32 to vector<1x1x1x128xf32>
    %18 = arith.mulf %17, %16 : vector<1x1x1x128xf32>
    %c4 = arith.constant 4 : index
    %19 = memref.load %arg2[%c4] : memref<12xf32, #tpu.memory_space<smem>>
    %c0_20 = arith.constant 0 : index
    %c1_21 = arith.constant 1 : index
    %c0_22 = arith.constant 0 : index
    %c0_23 = arith.constant 0 : index
    %20 = vector.load %arg3[%c0_20, %c1_21, %c0_22, %c0_23] : memref<1x6x1x128xf32, #tpu.memory_space<vmem>>, vector<1x1x1x128xf32>
    %21 = vector.broadcast %19 : f32 to vector<1x1x1x128xf32>
    %22 = arith.mulf %21, %20 : vector<1x1x1x128xf32>
    %23 = arith.addf %18, %22 : vector<1x1x1x128xf32>
    %c5 = arith.constant 5 : index
    %24 = memref.load %arg2[%c5] : memref<12xf32, #tpu.memory_space<smem>>
    %c0_24 = arith.constant 0 : index
    %c2_25 = arith.constant 2 : index
    %c0_26 = arith.constant 0 : index
    %c0_27 = arith.constant 0 : index
    %25 = vector.load %arg3[%c0_24, %c2_25, %c0_26, %c0_27] : memref<1x6x1x128xf32, #tpu.memory_space<vmem>>, vector<1x1x1x128xf32>
    %26 = vector.broadcast %24 : f32 to vector<1x1x1x128xf32>
    %27 = arith.mulf %26, %25 : vector<1x1x1x128xf32>
    %28 = arith.addf %23, %27 : vector<1x1x1x128xf32>
    %c0_28 = arith.constant 0 : index
    %c1_29 = arith.constant 1 : index
    %c0_30 = arith.constant 0 : index
    %c0_31 = arith.constant 0 : index
    %29 = vector.load %arg4[%c0_28, %c1_29, %c0_30, %c0_31] : memref<1x4x1x128xf32, #tpu.memory_space<vmem>>, vector<1x1x1x128xf32>
    tpu.vector_store %arg4[%c0_28, %c1_29, %c0_30, %c0_31], %28 {strides = array<i32>} : memref<1x4x1x128xf32, #tpu.memory_space<vmem>>, vector<1x1x1x128xf32>,
    %c6 = arith.constant 6 : index
    %30 = memref.load %arg2[%c6] : memref<12xf32, #tpu.memory_space<smem>>
    %c0_32 = arith.constant 0 : index
    %c3_33 = arith.constant 3 : index
    %c0_34 = arith.constant 0 : index
    %c0_35 = arith.constant 0 : index
    %31 = vector.load %arg3[%c0_32, %c3_33, %c0_34, %c0_35] : memref<1x6x1x128xf32, #tpu.memory_space<vmem>>, vector<1x1x1x128xf32>
    %32 = vector.broadcast %30 : f32 to vector<1x1x1x128xf32>
    %33 = arith.mulf %32, %31 : vector<1x1x1x128xf32>
    %c7 = arith.constant 7 : index
    %34 = memref.load %arg2[%c7] : memref<12xf32, #tpu.memory_space<smem>>
    %c0_36 = arith.constant 0 : index
    %c4_37 = arith.constant 4 : index
    %c0_38 = arith.constant 0 : index
    %c0_39 = arith.constant 0 : index
    %35 = vector.load %arg3[%c0_36, %c4_37, %c0_38, %c0_39] : memref<1x6x1x128xf32, #tpu.memory_space<vmem>>, vector<1x1x1x128xf32>
    %36 = vector.broadcast %34 : f32 to vector<1x1x1x128xf32>
    %37 = arith.mulf %36, %35 : vector<1x1x1x128xf32>
    %38 = arith.addf %33, %37 : vector<1x1x1x128xf32>
    %c8 = arith.constant 8 : index
    %39 = memref.load %arg2[%c8] : memref<12xf32, #tpu.memory_space<smem>>
    %c0_40 = arith.constant 0 : index
    %c5_41 = arith.constant 5 : index
    %c0_42 = arith.constant 0 : index
    %c0_43 = arith.constant 0 : index
    %40 = vector.load %arg3[%c0_40, %c5_41, %c0_42, %c0_43] : memref<1x6x1x128xf32, #tpu.memory_space<vmem>>, vector<1x1x1x128xf32>
    %41 = vector.broadcast %39 : f32 to vector<1x1x1x128xf32>
    %42 = arith.mulf %41, %40 : vector<1x1x1x128xf32>
    %43 = arith.addf %38, %42 : vector<1x1x1x128xf32>
    %c0_44 = arith.constant 0 : index
    %c2_45 = arith.constant 2 : index
    %c0_46 = arith.constant 0 : index
    %c0_47 = arith.constant 0 : index
    %44 = vector.load %arg4[%c0_44, %c2_45, %c0_46, %c0_47] : memref<1x4x1x128xf32, #tpu.memory_space<vmem>>, vector<1x1x1x128xf32>
    tpu.vector_store %arg4[%c0_44, %c2_45, %c0_46, %c0_47], %43 {strides = array<i32>} : memref<1x4x1x128xf32, #tpu.memory_space<vmem>>, vector<1x1x1x128xf32>,
    %c9 = arith.constant 9 : index
    %45 = memref.load %arg2[%c9] : memref<12xf32, #tpu.memory_space<smem>>
    %c0_48 = arith.constant 0 : index
    %c3_49 = arith.constant 3 : index
    %c0_50 = arith.constant 0 : index
    %c0_51 = arith.constant 0 : index
    %46 = vector.load %arg3[%c0_48, %c3_49, %c0_50, %c0_51] : memref<1x6x1x128xf32, #tpu.memory_space<vmem>>, vector<1x1x1x128xf32>
    %47 = vector.broadcast %45 : f32 to vector<1x1x1x128xf32>
    %48 = arith.mulf %47, %46 : vector<1x1x1x128xf32>
    %c10 = arith.constant 10 : index
    %49 = memref.load %arg2[%c10] : memref<12xf32, #tpu.memory_space<smem>>
    %c0_52 = arith.constant 0 : index
    %c4_53 = arith.constant 4 : index
    %c0_54 = arith.constant 0 : index
    %c0_55 = arith.constant 0 : index
    %50 = vector.load %arg3[%c0_52, %c4_53, %c0_54, %c0_55] : memref<1x6x1x128xf32, #tpu.memory_space<vmem>>, vector<1x1x1x128xf32>
    %51 = vector.broadcast %49 : f32 to vector<1x1x1x128xf32>
    %52 = arith.mulf %51, %50 : vector<1x1x1x128xf32>
    %53 = arith.addf %48, %52 : vector<1x1x1x128xf32>
    %c11 = arith.constant 11 : index
    %54 = memref.load %arg2[%c11] : memref<12xf32, #tpu.memory_space<smem>>
    %c0_56 = arith.constant 0 : index
    %c5_57 = arith.constant 5 : index
    %c0_58 = arith.constant 0 : index
    %c0_59 = arith.constant 0 : index
    %55 = vector.load %arg3[%c0_56, %c5_57, %c0_58, %c0_59] : memref<1x6x1x128xf32, #tpu.memory_space<vmem>>, vector<1x1x1x128xf32>
    %56 = vector.broadcast %54 : f32 to vector<1x1x1x128xf32>
    %57 = arith.mulf %56, %55 : vector<1x1x1x128xf32>
    %58 = arith.addf %53, %57 : vector<1x1x1x128xf32>
    %c0_60 = arith.constant 0 : index
    %c3_61 = arith.constant 3 : index
    %c0_62 = arith.constant 0 : index
    %c0_63 = arith.constant 0 : index
    %59 = vector.load %arg4[%c0_60, %c3_61, %c0_62, %c0_63] : memref<1x4x1x128xf32, #tpu.memory_space<vmem>>, vector<1x1x1x128xf32>
    tpu.vector_store %arg4[%c0_60, %c3_61, %c0_62, %c0_63], %58 {strides = array<i32>} : memref<1x4x1x128xf32, #tpu.memory_space<vmem>>, vector<1x1x1x128xf32>,
    return
  }
  func.func @transform_0(%arg0: i32, %arg1: i32) -> i32 {
    %c0_i32 = arith.constant 0 : i32
    %c0_i32_0 = arith.constant 0 : i32
    return %c0_i32 : i32
  }
  func.func @transform_1(%arg0: i32, %arg1: i32) -> (i32, i32, i32, i32) {
    %c0_i32 = arith.constant 0 : i32
    %c0_i32_0 = arith.constant 0 : i32
    %c0_i32_1 = arith.constant 0 : i32
    return %arg0, %c0_i32, %arg1, %c0_i32_0 : i32, i32, i32, i32
  }
  func.func @transform_2(%arg0: i32, %arg1: i32) -> (i32, i32, i32, i32) {
    %c0_i32 = arith.constant 0 : i32
    %c0_i32_0 = arith.constant 0 : i32
    %c0_i32_1 = arith.constant 0 : i32
    return %arg0, %c0_i32, %arg1, %c0_i32_0 : i32, i32, i32, i32
  }
}

</mosaic_0001>

<bundles_post_ra>
// kernel: tpu_custom_call.1
= control target key start
LH: loop header
LB: loop body
LE: loop exit
PB: predicated region body
PF: predicated region fallthrough
CT: control target
= control target key end

     0   :  { %7 = vsyncpa [#allocation5], 0  ;;  %s815_s0 = inlined_call_operand.hbm [shape: f32[12], index: 0, kind: input, shape index: {}]   ;;  %s816_s1 = inlined_call_operand.hbm [shape: f32[2,6,1,128], index: 1, kind: input, shape index: {}]   ;;  %s817_s2 = inlined_call_operand.hbm [shape: f32[2,4,1,128], index: 2, kind: output, shape index: {}]  }
   0x1   :  { %8 = vsyncpa [#allocation3], 0 }
   0x2   :  { %10 = vsyncpa [#allocation3 + $0x1], 0 }
   0x3   :  { %11 = vsyncpa [#allocation4], 0 }
   0x4   :  { %13 = vsyncpa [#allocation4 + $0x1], 0  ;;  %s637_s9 = smov 0   ;;  %s639_s10 = smov 0  }
   0x5   :  { %s641_s11 = smov 0   ;;  %s643_s12 = smov 0  }
   0x6   :  { %s645_s13 = smov 0   ;;  %s647_s14 = smov 0  }
   0x7 LB: > { %s371_s15 = sadd.s32 4294967295, %s613_s14   ;;  %s372_s16 = sadd.s32 4294967294, %s613_s14   ;;  %s613_s14 = sphi %s647_s14, %s19_s14   ;;  %s609_s13 = sphi %s645_s13, %s830_s13   ;;  %s605_s12 = sphi %s643_s12, %s829_s12   ;;  %s601_s11 = sphi %s641_s11, %s828_s11   ;;  %s597_s10 = sphi %s639_s10, %s827_s10   ;;  %s593_s9 = sphi %s637_s9, %s826_s9  }
   0x8   : > { %s61_s17 = sadd.s32 1, %s601_s11  ;;  %p68_p0 = scmp.ne.s32.totalorder %s601_s11, %s597_s10 }
   0x9   : > { %p69_p1 = scmp.eq.s32.totalorder %s613_s14, 0  ;;  %p74_p2 = scmp.ne.s32.totalorder %s597_s10, %s593_s9 }
   0xa   : > { %p675_p3 = scmp.eq.s32.totalorder %s371_s15, 0  ;;  %p100_p4 = scmp.eq.s32.totalorder %s371_s15, 1 }
   0xb   : > { %p70_p5 = por %p69_p1, %p68_p0  ;;  %p106_p6 = scmp.eq.s32.totalorder %s372_s16, 1 }
   0xc   : > { %p681_p7 = por %p675_p3, %p74_p2  ;;  %p685_p8 = por %p100_p4, %p68_p0 }
   0xd   : > { %p689_p9 = por %p106_p6, %p74_p2  ;;  %p373_p10 = scmp.ge.s32.totalorder %s613_s14, 1 }
   0xe   : > { %p113_p11 = scmp.lt.s32.totalorder %s613_s14, 3  ;;  %p434_p1 = scmp.lt.s32.totalorder %s613_s14, 2 }
   0xf   : > { %s821_s21 = scalar_select %p689_p9, 1, 0 }
  0x10   : > { %p696_p13 = pnand %p373_p10, %p113_p11  ;;  %s135_s23 = sand.u32 1, %s601_s11  }
  0x11   : > { %p704_p2 = pnand %p434_p1, %p70_p5  ;;  %s31_s25 = sadd.s32 1, %s609_s13 }
  0x12   : > { %p421_p0 = pneg %p696_p13  ;;  %s410_s26 = smul.u32 6, %s135_s23 }
  0x13   : > { %p33_p6 = scmp.ge.s32.totalorder %s31_s25, 2  ;;  %s615_s27 = smov [#allocation2]  }
  0x14   : > { %p422_p4 = pnand %p421_p0, %p675_p3  ;;  %s411_s30 = smul.u32 96, %s609_s13 }
  0x15   : > { %s832_s25 = smov (%p33_p6, %s31_s25), 0  ;;  %s139_s4 = scalar_lea.vmem [#allocation6], %s410_s26 }
  0x16   : > { %424 = dma.hbm_to_smem (!%p422_p4), %s815_s0, 16, %s615_s27, [#allocation5]  }
  0x17   : > { %s56_s3 = ssub.s32 %s609_s13, %s832_s25  ;;  %s147_s5 = sshll.u32 %s139_s4, 4  ;;  %s148_s5 = int_to_ptr.vmem [resolvable:$true] %s147_s5 }
  0x18   : > { %p59_p5 = scmp.eq.s32.totalorder %s56_s3, 0  ;;  %s146_s8 = scalar_lea.hbm %s816_s1, %s411_s30 }
  0x19   : > { %s136_s16 = scalar_lea.sflag [#allocation3], %s135_s23  ;;  %p503_p10 = pneg %p704_p2 }
  0x1a   : > { %s725_s15 = scalar_select %p59_p5, %s601_s11, %s61_s17  }
  0x1b   : > { %s514_s27 = scalar_lea.vmem %s148_s5, 96  ;;  %s616_s28 = smov [#allocation6]  }
  0x1c   : > { %p515_p11 = scmp.ne.s32.totalorder %s148_s5, %s514_s27  ;;  %s519_s29 = sshll.u32 %s616_s28, 4  ;;  %s520_s29 = int_to_ptr.vmem [resolvable:$false] %s519_s29 }
  0x1d   : > { %s521_s26 = scalar_lea.vmem %s520_s29, 192  ;;  %p522_p4 = scmp.lt.s32.totalorder %s148_s5, %s520_s29 }
  0x1e   : > { %p517_p1 = pnand %p515_p11, %p503_p10  ;;  %p523_p6 = scmp.lt.s32.totalorder %s521_s26, %s514_s27 }
  0x20   : > { %p518_p0 = pneg %p517_p1  ;;  %p524_p12 = por %p523_p6, %p522_p4 }
  0x22   : > { %p525_p9 = pnand %p524_p12, %p518_p0 }
  0x24   : > { %528 = shalt.err (!%p525_p9)
}
  0x25   : > { %s617_s30 = smov 16   ;;  %s618_s17 = smov 1  }
  0x26   : > { %428 = dma.hbm_to_vmem [thread:$0]  (!%p704_p2), %s146_s8, 96, %s148_s5, %s136_s16, %s617_s30, %s617_s30, %s618_s17  }
  0x27   : > { %159 = sbr.rel (%p696_p13) target bundleno = 89 (0x59), region = 28 }
  0x2c   : > { %580 = dma.done.wait (%p675_p3), [#allocation5], 16  }
  0x2d   : > { %582 = vsyncadd (%p675_p3), [#allocation5], 4294967280  ;;  %s738_s23 = sand.u32 1, %s597_s10  }
  0x2e   : > { %s412_s3 = smul.u32 6, %s738_s23  ;;  %s166_s4 = scalar_lea.sflag [#allocation3], %s738_s23 }
  0x30   : > { %s742_s6 = scalar_lea.vmem [#allocation6], %s412_s3 }
  0x31   : > { %584 = dma.done.wait (%p681_p7), %s166_s4, 96  }
  0x32   : > { %586 = vsyncadd (%p681_p7), %s166_s4, 4294967200 }
  0x33   : > { %174 = sfence }
  0x34   : > { %s191_s22 = sld [smem:[#allocation2]]  ;;  %v192_v0 = vld [vmem:[%s742_s6] sm:$0x1]  ;;  %v381_v1 = vld [vmem:[%s742_s6 + $0x1] sm:$0x1]  ;;  %s379_s27 = sshll.u32 %s738_s23, 2 }
  0x35   : > { %s380_s18 = sld [smem:[#allocation2 + $0x1]]  ;;  %v383_v3 = vld [vmem:[%s742_s6 + $0x2] sm:$0x1]  ;;  %v209_v6 = vld [vmem:[%s742_s6] sm:$0x1]  ;;  %s190_s17 = scalar_lea.vmem [#allocation7], %s379_s27 }
  0x36   : > { %s382_s24 = sld [smem:[#allocation2 + $0x2]]  ;;  %v386_v9 = vld [vmem:[%s742_s6 + $0x1] sm:$0x1]  ;;  %v388_v12 = vld [vmem:[%s742_s6 + $0x2] sm:$0x1]  ;;  %s274_s3 = sshll.u32 %s190_s17, 4  ;;  %s762_s3 = int_to_ptr.vmem [resolvable:$true] %s274_s3 }
  0x37   : > { %s384_s5 = sld [smem:[#allocation2 + $0x3]]  ;;  %v391_v16 = vld [vmem:[%s742_s6 + $0x3] sm:$0x1]  ;;  %v393_v19 = vld [vmem:[%s742_s6 + $0x4] sm:$0x1]  ;;  %s409_s4 = sshll.u32 %s605_s12, 6 }
  0x38   : > { %s385_s7 = sld [smem:[#allocation2 + $0x4]]  ;;  %v395_v23 = vld [vmem:[%s742_s6 + $0x5] sm:$0x1]  ;;  %v398_v27 = vld [vmem:[%s742_s6 + $0x3] sm:$0x1]  ;;  %s619_s12 = smov [#allocation7]  }
  0x39   : > { %s387_s8 = sld [smem:[#allocation2 + $0x5]]  ;;  %v400_v30 = vld [vmem:[%s742_s6 + $0x4] sm:$0x1]  ;;  %v402_v34 = vld [vmem:[%s742_s6 + $0x5] sm:$0x1] }
  0x3a   : > { %v193_v2 = vstv %s191_s22  ;;  %s390_s19 = sld [smem:[#allocation2 + $0x6]] }
  0x3b   : > { %v194_v4 = vmul.f32 %v193_v2, %v192_v0  ;;  %v198_v5 = vstv %s380_s18  ;;  %s392_s16 = sld [smem:[#allocation2 + $0x7]]  ;;  %s767_s18 = scalar_lea.hbm %s817_s2, %s409_s4 }
  0x3c   : > { %v199_v7 = vmul.f32 %v381_v1, %v198_v5  ;;  %v204_v8 = vstv %s382_s24  ;;  %s394_s28 = sld [smem:[#allocation2 + $0x8]]  ;;  %s260_s24 = scalar_lea.sflag [#allocation4], %s738_s23 }
  0x3d   : > { %v205_v10 = vmul.f32 %v383_v3, %v204_v8  ;;  %v210_v11 = vstv %s384_s5  ;;  %s397_s29 = sld [smem:[#allocation2 + $0x9]]  ;;  %s529_s5 = scalar_lea.vmem %s762_s3, 64 }
  0x3e   : > { %v200_v13 = vadd.f32 %v199_v7, %v194_v4  ;;  %v211_v14 = vmul.f32 %v210_v11, %v209_v6  ;;  %v214_v15 = vstv %s385_s7  ;;  %s399_s26 = sld [smem:[#allocation2 + $0xa]]  ;;  %p530_p3 = scmp.ne.s32.totalorder %s762_s3, %s529_s5 }
  0x3f   : > { %v215_v17 = vmul.f32 %v386_v9, %v214_v15  ;;  %v219_v18 = vstv %s387_s8  ;;  %s401_s30 = sld [smem:[#allocation2 + $0xb]]  ;;  %s533_s7 = sshll.u32 %s619_s12, 4  ;;  %s534_s7 = int_to_ptr.vmem [resolvable:$false] %s533_s7 }
  0x40   : > { %v206_v20 = vadd.f32 %v205_v10, %v200_v13  ;;  %v220_v21 = vmul.f32 %v388_v12, %v219_v18  ;;  %v227_v22 = vstv %s390_s19  ;;  %p531_p7 = pnand %p530_p3, %p685_p8  ;;  %s535_s8 = scalar_lea.vmem %s534_s7, 128 }
  0x41   : > { %v216_v24 = vadd.f32 %v215_v17, %v211_v14  ;;  %v228_v25 = vmul.f32 %v391_v16, %v227_v22  ;;  %v232_v26 = vstv %s392_s16  ;;  %p536_p12 = scmp.lt.s32.totalorder %s762_s3, %s534_s7  ;;  %p537_p13 = scmp.lt.s32.totalorder %s535_s8, %s529_s5 }
  0x42   : > { %207 = vst [vmem:[%s190_s17] sm:$0x1] %v206_v20  ;;  %v233_v28 = vmul.f32 %v393_v19, %v232_v26  ;;  %v238_v29 = vstv %s394_s28  ;;  %p532_p9 = pneg %p531_p7 }
  0x43   : > { %v221_v31 = vadd.f32 %v220_v21, %v216_v24  ;;  %v239_v32 = vmul.f32 %v395_v23, %v238_v29  ;;  %v245_v33 = vstv %s397_s29  ;;  %p538_p2 = por %p537_p13, %p536_p12 }
  0x44   : > { %v234_v35 = vadd.f32 %v233_v28, %v228_v25  ;;  %v246_v36 = vmul.f32 %v398_v27, %v245_v33  ;;  %v249_v37 = vstv %s399_s26 }
  0x45   : > { %389 = vst [vmem:[%s190_s17 + $0x1] sm:$0x1] %v221_v31  ;;  %v250_v38 = vmul.f32 %v400_v30, %v249_v37  ;;  %v254_v39 = vstv %s401_s30  ;;  %p539_p5 = pnand %p538_p2, %p532_p9 }
  0x46   : > { %v240_v40 = vadd.f32 %v239_v32, %v234_v35  ;;  %v255_v41 = vmul.f32 %v402_v34, %v254_v39 }
  0x47   : > { %v251_v42 = vadd.f32 %v250_v38, %v246_v36 }
  0x48   : > { %396 = vst [vmem:[%s190_s17 + $0x2] sm:$0x1] %v240_v40 }
  0x49   : > { %v256_v43 = vadd.f32 %v255_v41, %v251_v42 }
  0x4b   : > { %403 = vst [vmem:[%s190_s17 + $0x3] sm:$0x1] %v256_v43 }
  0x4c   : > { %542 = shalt.err (!%p539_p5)
}
  0x4d   : > { %s543_s19 = scalar_lea.hbm %s767_s18, 64  ;;  %s547_s28 = scalar_lea.hbm %s817_s2, 128 }
  0x4e   : > { %p544_p10 = scmp.ne.s32.totalorder %s767_s18, %s543_s19  ;;  %p548_p0 = scmp.lt.s32.totalorder %s767_s18, %s817_s2 }
  0x4f   : > { %p549_p4 = scmp.lt.s32.totalorder %s547_s28, %s543_s19 }
  0x50   : > { %p545_p11 = pnand %p544_p10, %p685_p8 }
  0x51   : > { %p550_p6 = por %p549_p4, %p548_p0 }
  0x52   : > { %p546_p1 = pneg %p545_p11 }
  0x54   : > { %p551_p3 = pnand %p550_p6, %p546_p1 }
  0x56   : > { %554 = shalt.err (!%p551_p3)
}
  0x57   : > { %s620_s30 = smov 16   ;;  %s621_s17 = smov 1  }
  0x58   : > { %419 = dma.vmem_to_hbm [thread:$0]  (%p685_p8), %s762_s3, 64, %s767_s18, %s260_s24, %s620_s30, %s620_s30, %s621_s17  }
  0x59 PF: > { %s289_s4 = sand.u32 1, %s593_s9   ;;  %p824_p7 = scmp.ne.s32.totalorder %s821_s21, 0 }
  0x5a   : > { %p825_p9 = scmp.ge.s32.totalorder %s613_s14, 2  ;;  %s290_s6 = scalar_lea.sflag [#allocation4], %s289_s4 }
  0x5c   : > { %p430_p12 = pnand %p825_p9, %p824_p7 }
  0x5e   : > { %p431_p13 = pneg %p430_p12 }
  0x60   : > { %588 = dma.done.wait (%p431_p13), %s290_s6, 64  }
  0x61   : > { %590 = vsyncadd (%p431_p13), %s290_s6, 4294967232  ;;  %s19_s14 = sadd.s32 1, %s613_s14   ;;  %s826_s9 = smov %s597_s10 }
  0x62   : > { %p16_p2 = scmp.ge.s32.totalorder %s19_s14, 4   ;;  %s827_s10 = smov %s601_s11 }
  0x63   : > { %s828_s11 = smov %s725_s15  ;;  %s829_s12 = smov %s609_s13 }
  0x64   : > { %s830_s13 = smov %s832_s25  ;;  %18 = sbr.rel (!%p16_p2) target bundleno = 7 (0x7), region = 86 }
  0x69   :  { %295 = vsyncpa [#allocation3], 1 }
  0x6a   :  { %297 = vsyncpa [#allocation3 + $0x1], 1 }
  0x6b   :  { %298 = vsyncpa [#allocation4], 1 }
  0x6c   :  { %300 = vsyncpa [#allocation4 + $0x1], 1 }
  0x6d   :  { %301 = vsyncpa [#allocation5], 1 }
  0x6e   :  { %303 = vsyncpa [#allocation5 + $0x1], 1 }

</bundles_post_ra>
